<compile_context>
chip_gen: v7x
topology: tpu7x:2x2x1
jax: 0.10.0
libtpu: 0.0.40
codegen_flags: <defaults>
</compile_context>

<pallas_src>
import functools

import jax
import jax.numpy as jnp
from jax import lax
from jax.experimental import pallas as pl
from jax.experimental.pallas import tpu as pltpu


def _nt_xent_kernel(h_row_ref, h_col_ref, h_pos_ref, o_ref, acc_ref, *, pos_roll):
    i = pl.program_id(0)                      # row-tile index
    j = pl.program_id(1)                      # col-tile index (reduction axis)
    tr = h_row_ref.shape[0]
    tc = h_col_ref.shape[0]

    @pl.when(j == 0)
    def _init():
        acc_ref[...] = jnp.zeros_like(acc_ref)

    hr = h_row_ref[...]                       # (tr, D), native dtype -> MXU
    hc = h_col_ref[...]                       # (tc, D)
    hr32 = hr.astype(jnp.float32)
    hc32 = hc.astype(jnp.float32)

    sq_r = jnp.sum(hr32 * hr32, axis=-1, keepdims=True)        # (tr, 1)
    sq_c = jnp.sum(hc32 * hc32, axis=-1, keepdims=True)        # (tc, 1)

    # Gram tile: contract D of both operands -> no explicit transpose of hc.
    gram = lax.dot_general(hr, hc, (((1,), (1,)), ((), ())),
                           preferred_element_type=jnp.float32)  # (tr, tc)

    d2 = jnp.maximum(sq_r + sq_c.T - 2.0 * gram, 0.0)
    sim = jnp.exp(-0.5 * d2)                   # heat-kernel similarity, in (0, 1]
    e_sim = jnp.exp(sim)                       # bounded by e -> no max pass needed

    acc_ref[...] += jnp.sum(e_sim, axis=-1, keepdims=True)

    # Remove the self-similarity (diagonal) contribution exactly as accumulated,
    # only on tiles whose row/col ranges intersect the diagonal.
    has_diag = jnp.logical_and(i * tr < (j + 1) * tc, j * tc < (i + 1) * tr)

    @pl.when(has_diag)
    def _drop_diag():
        r_g = i * tr + lax.broadcasted_iota(jnp.int32, (tr, tc), 0)
        c_g = j * tc + lax.broadcasted_iota(jnp.int32, (tr, tc), 1)
        diag = jnp.where(r_g == c_g, e_sim, 0.0)
        acc_ref[...] -= jnp.sum(diag, axis=-1, keepdims=True)

    @pl.when(j == pl.num_programs(1) - 1)
    def _finalize():
        hp32 = h_pos_ref[...].astype(jnp.float32)
        if pos_roll:
            # Fallback path (single full-extent row tile): partner rows are the
            # same tile rolled by B along the sublane axis.
            hp32 = pltpu.roll(hp32, shift=pos_roll, axis=0)
        diff = hr32 - hp32
        pos = jnp.exp(-0.5 * jnp.sum(diff * diff, axis=-1, keepdims=True))  # (tr, 1)
        lse = jnp.log(acc_ref[...])                                          # (tr, 1)
        # Lane-dense store of per-row partial losses.
        o_ref[...] = jnp.broadcast_to(lse - pos, o_ref.shape)


def _pick_tile(extent, cap):
    for cand in (512, 256, 128, 64, 32, 16, 8):
        if cand <= cap and extent % cand == 0:
            return cand
    return extent


def contrastive_loss(h_i, h_j):
    """h_i, h_j: (B, D) feature batches. Returns scalar loss (float32)."""
    assert h_i.ndim == 2 and h_i.shape == h_j.shape
    b, d = h_i.shape
    n = 2 * b

    # TODO(synk): the concat is an extra O(N*D) HBM round-trip; could be removed
    # by feeding h_i / h_j as two inputs with half-aware index_maps.
    h = jnp.concatenate([h_i, h_j], axis=0)            # (N, D)
    itemsize = jnp.dtype(h.dtype).itemsize

    # Keep feature tiles comfortably inside scoped VMEM on every generation.
    row_cap = max(8, min(512, (2 * 1024 * 1024) // max(1, d * itemsize)))

    if b % 8 == 0:
        tr = _pick_tile(b, row_cap)                    # row tile divides B
        pos_roll = 0
    else:
        tr = n                                         # full-extent row tile
        pos_roll = b                                   # positive via in-kernel roll

    tc = _pick_tile(n, row_cap)                        # col tile divides N
    if tc % 8 != 0 and tc != n:
        tc = n

    n_row = n // tr
    n_col = n // tc
    half = (b // tr) if pos_roll == 0 else 0           # partner row-tile offset

    kernel = functools.partial(_nt_xent_kernel, pos_roll=pos_roll)

    out = pl.pallas_call(
        kernel,
        out_shape=jax.ShapeDtypeStruct((n, 128), jnp.float32),
        grid_spec=pltpu.PrefetchScalarGridSpec(
            num_scalar_prefetch=0,
            grid=(n_row, n_col),
            in_specs=[
                pl.BlockSpec((tr, d), lambda i, j: (i, 0)),                     # row tile
                pl.BlockSpec((tc, d), lambda i, j: (j, 0)),                     # col tile (streamed)
                pl.BlockSpec((tr, d), lambda i, j: ((i + half) % n_row, 0)),    # positive-partner tile
            ],
            out_specs=pl.BlockSpec((tr, 128), lambda i, j: (i, 0)),
            scratch_shapes=[pltpu.VMEM((tr, 1), jnp.float32)],                  # running sum-of-exp
        ),
        compiler_params=pltpu.CompilerParams(
            dimension_semantics=("parallel", "arbitrary"),
            vmem_limit_bytes=32 * 1024 * 1024,
        ),
        cost_estimate=pl.CostEstimate(
            flops=2 * n * n * d,
            transcendentals=2 * n * n,
            bytes_accessed=(2 + n_row) * n * d * itemsize + n * 128 * 4,
        ),
    )(h, h, h)

    # Tiny final reduction in the wrapper (per-tile partials keep row tiles independent).
    return jnp.sum(out[:, 0]) / jnp.float32(n)


def _reference_loss(h_i, h_j):
    """Pure-JAX reference implementing the PyTorch forward exactly."""
    bsz = h_i.shape[0]
    n = 2 * bsz
    h = jnp.concatenate([h_i, h_j], axis=0).astype(jnp.float32)
    d2 = jnp.sum((h[:, None, :] - h[None, :, :]) ** 2, axis=-1)
    sim = jnp.exp(-0.5 * d2)
    idx = jnp.arange(n)
    pos = sim[idx, (idx + bsz) % n]
    logits = jnp.where(jnp.eye(n, dtype=bool), -jnp.inf, sim)
    lse = jax.scipy.special.logsumexp(logits, axis=-1)
    return jnp.sum(lse - pos) / n


if __name__ == "__main__":
    batch = 8        # -> N = 16 (row tiles of 8 satisfy the (8, 128) tiling rule)
    hidden = 32
    key = jax.random.PRNGKey(0)
    k1, k2 = jax.random.split(key)
    h_i = jax.random.normal(k1, (batch, hidden), dtype=jnp.float32)
    h_j = jax.random.normal(k2, (batch, hidden), dtype=jnp.float32)

    loss = jax.block_until_ready(contrastive_loss(h_i, h_j))
    ref = jax.block_until_ready(_reference_loss(h_i, h_j))

    assert jnp.isfinite(loss), "loss is not finite"
    assert jnp.allclose(loss, ref, rtol=1e-4, atol=1e-4), (loss, ref)
    print("KERNEL_OK")
</pallas_src>

<mosaic_0001>
module attributes {stable_mosaic.version = 11 : i64} {
  func.func @_nt_xent_kernel(%arg0: i32, %arg1: i32, %arg2: memref<8x32xf32, #tpu.memory_space<vmem>>, %arg3: memref<16x32xf32, #tpu.memory_space<vmem>>, %arg4: memref<8x32xf32, #tpu.memory_space<vmem>>, %arg5: memref<8x128xf32, #tpu.memory_space<vmem>>, %arg6: memref<8x1xf32, #tpu.memory_space<vmem>>) attributes {dimension_semantics = [#tpu.dimension_semantics<parallel>, #tpu.dimension_semantics<arbitrary>], iteration_bounds = array<i64: 2, 1>, scalar_prefetch = 0 : i64, scratch_operands = 1 : i64, tpu.core_type = #tpu.core_type<tc>, window_params = [{transform_indices = @transform_0, window_bounds = array<i64: 8, 32>}, {transform_indices = @transform_1, window_bounds = array<i64: 16, 32>}, {transform_indices = @transform_2, window_bounds = array<i64: 8, 32>}, {transform_indices = @transform_3, window_bounds = array<i64: 8, 128>}]} {
    %c0_i32 = arith.constant 0 : i32
    %0 = arith.cmpi eq, %arg1, %c0_i32 : i32
    %1 = arith.extui %0 : i1 to i32
    %c0_i32_0 = arith.constant 0 : i32
    %2 = arith.cmpi ne, %1, %c0_i32_0 : i32
    scf.if %2 {
      %cst_20 = arith.constant 0.000000e+00 : f32
      %44 = vector.broadcast %cst_20 : f32 to vector<8x1xf32>
      %c0_21 = arith.constant 0 : index
      %c0_22 = arith.constant 0 : index
      %45 = vector.load %arg6[%c0_21, %c0_22] : memref<8x1xf32, #tpu.memory_space<vmem>>, vector<8x1xf32>
      tpu.vector_store %arg6[%c0_21, %c0_22], %44 {strides = array<i32>} : memref<8x1xf32, #tpu.memory_space<vmem>>, vector<8x1xf32>,
    } else {
    }
    %c0 = arith.constant 0 : index
    %c0_1 = arith.constant 0 : index
    %3 = vector.load %arg2[%c0, %c0_1] : memref<8x32xf32, #tpu.memory_space<vmem>>, vector<8x32xf32>
    %c0_2 = arith.constant 0 : index
    %c0_3 = arith.constant 0 : index
    %4 = vector.load %arg3[%c0_2, %c0_3] : memref<16x32xf32, #tpu.memory_space<vmem>>, vector<16x32xf32>
    %5 = arith.mulf %3, %3 : vector<8x32xf32>
    %cst = arith.constant dense<0.000000e+00> : vector<8xf32>
    %6 = vector.multi_reduction <add>, %5, %cst [1] : vector<8x32xf32> to vector<8xf32>
    %7 = vector.shape_cast %6 : vector<8xf32> to vector<8x1xf32>
    %8 = arith.mulf %4, %4 : vector<16x32xf32>
    %cst_4 = arith.constant dense<0.000000e+00> : vector<16xf32>
    %9 = vector.multi_reduction <add>, %8, %cst_4 [1] : vector<16x32xf32> to vector<16xf32>
    %10 = vector.shape_cast %9 : vector<16xf32> to vector<16x1xf32>
    %cst_5 = arith.constant dense<0.000000e+00> : vector<8x16xf32>
    %11 = tpu.matmul %3, %4, %cst_5 {dimension_numbers = #tpu.dot_dimension_numbers<[1], [1], [0], [0], [0, 0, 1, 0], [], []>} : vector<8x32xf32>, vector<16x32xf32>, vector<8x16xf32> -> vector<8x16xf32>
    %12 = tpu.transpose %10, [1, 0] : vector<16x1xf32> -> vector<1x16xf32>
    %13 = vector.broadcast %7 : vector<8x1xf32> to vector<8x16xf32>
    %14 = vector.broadcast %12 : vector<1x16xf32> to vector<8x16xf32>
    %15 = arith.addf %13, %14 : vector<8x16xf32>
    %cst_6 = arith.constant 2.000000e+00 : f32
    %16 = vector.broadcast %cst_6 : f32 to vector<8x16xf32>
    %17 = arith.mulf %16, %11 : vector<8x16xf32>
    %18 = arith.subf %15, %17 : vector<8x16xf32>
    %cst_7 = arith.constant 0.000000e+00 : f32
    %19 = vector.broadcast %cst_7 : f32 to vector<8x16xf32>
    %20 = arith.maximumf %18, %19 : vector<8x16xf32>
    %cst_8 = arith.constant -5.000000e-01 : f32
    %21 = vector.broadcast %cst_8 : f32 to vector<8x16xf32>
    %22 = arith.mulf %21, %20 : vector<8x16xf32>
    %23 = math.exp %22 : vector<8x16xf32>
    %24 = math.exp %23 : vector<8x16xf32>
    %c0_9 = arith.constant 0 : index
    %c0_10 = arith.constant 0 : index
    %25 = vector.load %arg6[%c0_9, %c0_10] : memref<8x1xf32, #tpu.memory_space<vmem>>, vector<8x1xf32>
    %cst_11 = arith.constant dense<0.000000e+00> : vector<8xf32>
    %26 = vector.multi_reduction <add>, %24, %cst_11 [1] : vector<8x16xf32> to vector<8xf32>
    %27 = vector.shape_cast %26 : vector<8xf32> to vector<8x1xf32>
    %28 = arith.addf %25, %27 : vector<8x1xf32>
    %c0_12 = arith.constant 0 : index
    %c0_13 = arith.constant 0 : index
    %29 = vector.load %arg6[%c0_12, %c0_13] : memref<8x1xf32, #tpu.memory_space<vmem>>, vector<8x1xf32>
    tpu.vector_store %arg6[%c0_12, %c0_13], %28 {strides = array<i32>} : memref<8x1xf32, #tpu.memory_space<vmem>>, vector<8x1xf32>,
    %c8_i32 = arith.constant 8 : i32
    %30 = arith.muli %arg0, %c8_i32 : i32
    %c1_i32 = arith.constant 1 : i32
    %31 = arith.addi %arg1, %c1_i32 : i32
    %c16_i32 = arith.constant 16 : i32
    %32 = arith.muli %31, %c16_i32 : i32
    %33 = arith.cmpi slt, %30, %32 : i32
    %c16_i32_14 = arith.constant 16 : i32
    %34 = arith.muli %arg1, %c16_i32_14 : i32
    %c1_i32_15 = arith.constant 1 : i32
    %35 = arith.addi %arg0, %c1_i32_15 : i32
    %c8_i32_16 = arith.constant 8 : i32
    %36 = arith.muli %35, %c8_i32_16 : i32
    %37 = arith.cmpi slt, %34, %36 : i32
    %38 = arith.andi %33, %37 : i1
    %39 = arith.extui %38 : i1 to i32
    %c0_i32_17 = arith.constant 0 : i32
    %40 = arith.cmpi ne, %39, %c0_i32_17 : i32
    scf.if %40 {
      %c8_i32_20 = arith.constant 8 : i32
      %44 = arith.muli %arg0, %c8_i32_20 : i32
      %45 = tpu.iota {dimensions = array<i32: 0>} : vector<8x16xi32>
      %46 = vector.broadcast %44 : i32 to vector<8x16xi32>
      %47 = arith.addi %46, %45 : vector<8x16xi32>
      %c16_i32_21 = arith.constant 16 : i32
      %48 = arith.muli %arg1, %c16_i32_21 : i32
      %49 = tpu.iota {dimensions = array<i32: 1>} : vector<8x16xi32>
      %50 = vector.broadcast %48 : i32 to vector<8x16xi32>
      %51 = arith.addi %50, %49 : vector<8x16xi32>
      %52 = arith.cmpi eq, %47, %51 : vector<8x16xi32>
      %cst_22 = arith.constant 0.000000e+00 : f32
      %53 = vector.broadcast %cst_22 : f32 to vector<8x16xf32>
      %54 = arith.select %52, %24, %53 : vector<8x16xi1>, vector<8x16xf32>
      %c0_23 = arith.constant 0 : index
      %c0_24 = arith.constant 0 : index
      %55 = vector.load %arg6[%c0_23, %c0_24] : memref<8x1xf32, #tpu.memory_space<vmem>>, vector<8x1xf32>
      %cst_25 = arith.constant dense<0.000000e+00> : vector<8xf32>
      %56 = vector.multi_reduction <add>, %54, %cst_25 [1] : vector<8x16xf32> to vector<8xf32>
      %57 = vector.shape_cast %56 : vector<8xf32> to vector<8x1xf32>
      %58 = arith.subf %55, %57 : vector<8x1xf32>
      %c0_26 = arith.constant 0 : index
      %c0_27 = arith.constant 0 : index
      %59 = vector.load %arg6[%c0_26, %c0_27] : memref<8x1xf32, #tpu.memory_space<vmem>>, vector<8x1xf32>
      tpu.vector_store %arg6[%c0_26, %c0_27], %58 {strides = array<i32>} : memref<8x1xf32, #tpu.memory_space<vmem>>, vector<8x1xf32>,
    } else {
    }
    %c0_i32_18 = arith.constant 0 : i32
    %41 = arith.cmpi eq, %arg1, %c0_i32_18 : i32
    %42 = arith.extui %41 : i1 to i32
    %c0_i32_19 = arith.constant 0 : i32
    %43 = arith.cmpi ne, %42, %c0_i32_19 : i32
    scf.if %43 {
      %c0_20 = arith.constant 0 : index
      %c0_21 = arith.constant 0 : index
      %44 = vector.load %arg4[%c0_20, %c0_21] : memref<8x32xf32, #tpu.memory_space<vmem>>, vector<8x32xf32>
      %45 = arith.subf %3, %44 : vector<8x32xf32>
      %46 = arith.mulf %45, %45 : vector<8x32xf32>
      %cst_22 = arith.constant dense<0.000000e+00> : vector<8xf32>
      %47 = vector.multi_reduction <add>, %46, %cst_22 [1] : vector<8x32xf32> to vector<8xf32>
      %48 = vector.shape_cast %47 : vector<8xf32> to vector<8x1xf32>
      %cst_23 = arith.constant -5.000000e-01 : f32
      %49 = vector.broadcast %cst_23 : f32 to vector<8x1xf32>
      %50 = arith.mulf %49, %48 : vector<8x1xf32>
      %51 = math.exp %50 : vector<8x1xf32>
      %c0_24 = arith.constant 0 : index
      %c0_25 = arith.constant 0 : index
      %52 = vector.load %arg6[%c0_24, %c0_25] : memref<8x1xf32, #tpu.memory_space<vmem>>, vector<8x1xf32>
      %53 = math.log %52 : vector<8x1xf32>
      %54 = arith.subf %53, %51 : vector<8x1xf32>
      %55 = vector.shape_cast %54 : vector<8x1xf32> to vector<8x1xf32>
      %56 = vector.broadcast %55 : vector<8x1xf32> to vector<8x128xf32>
      %c0_26 = arith.constant 0 : index
      %c0_27 = arith.constant 0 : index
      %57 = vector.load %arg5[%c0_26, %c0_27] : memref<8x128xf32, #tpu.memory_space<vmem>>, vector<8x128xf32>
      tpu.vector_store %arg5[%c0_26, %c0_27], %56 {strides = array<i32>} : memref<8x128xf32, #tpu.memory_space<vmem>>, vector<8x128xf32>,
    } else {
    }
    return
  }
  func.func @transform_0(%arg0: i32, %arg1: i32) -> (i32, i32) {
    %c0_i32 = arith.constant 0 : i32
    %c0_i32_0 = arith.constant 0 : i32
    return %arg0, %c0_i32 : i32, i32
  }
  func.func @transform_1(%arg0: i32, %arg1: i32) -> (i32, i32) {
    %c0_i32 = arith.constant 0 : i32
    %c0_i32_0 = arith.constant 0 : i32
    return %arg1, %c0_i32 : i32, i32
  }
  func.func @transform_2(%arg0: i32, %arg1: i32) -> (i32, i32) {
    %c1_i32 = arith.constant 1 : i32
    %0 = arith.addi %arg0, %c1_i32 : i32
    %c2_i32 = arith.constant 2 : i32
    %c0_i32 = arith.constant 0 : i32
    %1 = arith.cmpi eq, %c2_i32, %c0_i32 : i32
    %c1_i32_0 = arith.constant 1 : i32
    %2 = arith.select %1, %c1_i32_0, %c2_i32 : i32
    %3 = arith.remsi %0, %2 : i32
    %c0_i32_1 = arith.constant 0 : i32
    %4 = arith.cmpi ne, %3, %c0_i32_1 : i32
    %c0_i32_2 = arith.constant 0 : i32
    %5 = arith.cmpi slt, %3, %c0_i32_2 : i32
    %c0_i32_3 = arith.constant 0 : i32
    %6 = arith.cmpi slt, %2, %c0_i32_3 : i32
    %7 = arith.xori %5, %6 : i1
    %8 = arith.andi %7, %4 : i1
    %9 = arith.addi %3, %2 : i32
    %10 = arith.select %8, %9, %3 : i32
    %c0_i32_4 = arith.constant 0 : i32
    %c0_i32_5 = arith.constant 0 : i32
    return %10, %c0_i32_4 : i32, i32
  }
  func.func @transform_3(%arg0: i32, %arg1: i32) -> (i32, i32) {
    %c0_i32 = arith.constant 0 : i32
    %c0_i32_0 = arith.constant 0 : i32
    return %arg0, %c0_i32 : i32, i32
  }
}

</mosaic_0001>

<bundles_post_ra>
// kernel: tpu_custom_call.1
= control target key start
LH: loop header
LB: loop body
LE: loop exit
PB: predicated region body
PF: predicated region fallthrough
CT: control target
= control target key end

     0   :  { %s1390_s0 = inlined_call_operand.hbm [shape: f32[16,32], index: 0, kind: input, shape index: {}]   ;;  %s1391_s1 = inlined_call_operand.hbm [shape: f32[16,32], index: 1, kind: input, shape index: {}]   ;;  %s1392_s2 = inlined_call_operand.hbm [shape: f32[16,32], index: 2, kind: input, shape index: {}]   ;;  %s1393_s3 = inlined_call_operand.hbm [shape: f32[16,128], index: 3, kind: output, shape index: {}]  }
   0x1   :  { %1403 = sst [smem:[#allocation16_spill]] %s1390_s0 }
   0x2   :  { %8 = vsyncpa [#allocation4], 0 }
   0x3   :  { %10 = vsyncpa [#allocation4 + $0x1], 0 }
   0x4   :  { %11 = vsyncpa [#allocation7], 0 }
   0x5   :  { %12 = vsyncpa [#allocation5], 0 }
   0x6   :  { %14 = vsyncpa [#allocation5 + $0x1], 0  ;;  %s1036_s12 = smov 0   ;;  %s1038_s13 = smov 0  }
   0x7   :  { %s1040_s14 = smov 0   ;;  %s1042_s15 = smov 0  }
   0x8   :  { %s1044_s16 = smov 0   ;;  %s1046_s17 = smov 0  }
   0x9   :  { %s1048_s18 = smov 0   ;;  %s1050_s19 = smov 0  }
   0xa   :  { %s1052_s20 = smov 0  }
   0xb LB: > { %1404 = sst [smem:[#allocation14_spill]] %s1000_s19  ;;  %s1082_s21 = sadd.s32 4294967295, %s1004_s20   ;;  %s1004_s20 = sphi %s1052_s20, %s20_s20   ;;  %s1000_s19 = sphi %s1050_s19, %s1428_s19   ;;  %s996_s18 = sphi %s1048_s18, %s1427_s18   ;;  %s992_s17 = sphi %s1046_s17, %s1434_s17   ;;  %s988_s16 = sphi %s1044_s16, %s1433_s16   ;;  %s984_s15 = sphi %s1042_s15, %s1432_s15   ;;  %s980_s14 = sphi %s1040_s14, %s1431_s14   ;;  %s976_s13 = sphi %s1038_s13, %s1430_s13   ;;  %s972_s12 = sphi %s1036_s12, %s1429_s12  }
   0xc   : > { %s637_s22 = sadd.s32 4294967294, %s1004_s20   ;;  %s32_s23 = sadd.s32 1, %s1000_s19 }
   0xd   : > { %s39_s24 = sadd.s32 1, %s992_s17  ;;  %p34_p0 = scmp.ge.s32.totalorder %s32_s23, 2 }
   0xe   : > { %p46_p1 = scmp.ne.s32.totalorder %s992_s17, %s988_s16  ;;  %p1395_p2 = scmp.eq.s32.totalorder %s1004_s20, 0 }
   0xf   : > { %p1396_p3 = scmp.ne.s32.totalorder %s988_s16, %s984_s15  ;;  %s90_s28 = ssub.s32 0, %s32_s23 }
  0x10   : > { %s1092_s25 = scalar_select %p34_p0, 0, %s32_s23  }
  0x11   : > { %p1099_p4 = por %p1395_p2, %p46_p1  ;;  %s1105_s29 = smin.u32 %s90_s28, %s32_s23 }
  0x12   : > { %1405 = sst [smem:[#allocation15_spill]] %s1092_s25  ;;  %s36_s27 = ssub.s32 %s1000_s19, %s1092_s25 }
  0x13   : > { %p37_p5 = scmp.eq.s32.totalorder %s36_s27, 0  ;;  %s101_s30 = sadd.s32 1, %s1092_s25 }
  0x14   : > { %p154_p6 = scmp.eq.s32.totalorder %s1082_s21, 1  ;;  %s103_s5 = ssub.s32 0, %s101_s30 }
  0x15   : > { %s1110_s4 = scalar_select %p37_p5, %s992_s17, %s39_s24  }
  0x16   : > { %s641_s6 = smin.u32 %s103_s5, %s101_s30  ;;  %p1115_p7 = por %p154_p6, %p46_p1 }
  0x17   : > { %s1119_s8 = sand.u32 1, %s641_s6   ;;  %p160_p8 = scmp.eq.s32.totalorder %s637_s22, 1 }
  0x18   : > { %s1407_s7 = scalar_select %p1115_p7, 1, 0 }
  0x19   : > { %p1124_p9 = por %p160_p8, %p1396_p3  ;;  %p1394_p11 = scmp.lt.s32.totalorder %s1004_s20, 2 }
  0x1a   : > { %s196_s10 = sand.u32 1, %s1004_s20   ;;  %s198_s11 = sand.u32 1, %s992_s17  }
  0x1b   : > { %s1408_s9 = scalar_select %p1124_p9, 1, 0 }
  0x1c   : > { %s647_s23 = sshll.u32 %s198_s11, 3  ;;  %s648_s24 = sshll.u32 %s1000_s19, 7 }
  0x1d   : > { %s1409_s0 = sld [smem:[#allocation16_spill]]  ;;  %s200_s22 = scalar_lea.vmem [#allocation3], %s647_s23 }
  0x1e   : > { %s207_s5 = sshll.u32 %s200_s22, 4  ;;  %p1142_p12 = pnand %p1394_p11, %p1099_p4  ;;  %s1146_s5 = int_to_ptr.vmem [resolvable:$true] %s207_s5 }
  0x1f   : > { %s1148_s11 = scalar_lea.sflag [#allocation4], %s196_s10 }
  0x20   : > { %p804_p0 = pneg %p1142_p12 }
  0x23   : > { %s1136_s30 = scalar_lea.hbm %s1409_s0, %s648_s24  ;;  %s807_s27 = scalar_lea.hbm %s1409_s0, 256 }
  0x24   : > { %s802_s24 = scalar_lea.hbm %s1136_s30, 128  ;;  %p808_p4 = scmp.lt.u32.totalorder %s1136_s30, %s1409_s0 }
  0x25   : > { %p803_p13 = scmp.ne.s32.totalorder %s1136_s30, %s802_s24  ;;  %p809_p6 = scmp.lt.u32.totalorder %s807_s27, %s802_s24 }
  0x26   : > { %p811_p10 = scmp.lt.u32.totalorder %s802_s24, %s1136_s30 }
  0x27   : > { %p805_p1 = pnand %p804_p0, %p803_p13  ;;  %p810_p8 = por %p809_p6, %p808_p4 }
  0x29   : > { %p806_p5 = pneg %p805_p1  ;;  %p812_p11 = por %p811_p10, %p810_p8 }
  0x2b   : > { %p813_p2 = pnand %p812_p11, %p806_p5 }
  0x2d   : > { %816 = shalt.err (!%p813_p2)
}
  0x2e   : > { %s817_s10 = scalar_lea.vmem %s1146_s5, 128  ;;  %s1006_s26 = smov [#allocation3]  }
  0x2f   : > { %p818_p13 = scmp.ne.s32.totalorder %s1146_s5, %s817_s10  ;;  %s822_s23 = sshll.u32 %s1006_s26, 4  ;;  %s823_s23 = int_to_ptr.vmem [resolvable:$false] %s822_s23 }
  0x30   : > { %s824_s28 = scalar_lea.vmem %s823_s23, 256  ;;  %p825_p9 = scmp.lt.s32.totalorder %s1146_s5, %s823_s23 }
  0x31   : > { %p820_p1 = pnand %p818_p13, %p804_p0  ;;  %p826_p4 = scmp.lt.s32.totalorder %s824_s28, %s817_s10 }
  0x33   : > { %p821_p3 = pneg %p820_p1  ;;  %p827_p6 = por %p826_p4, %p825_p9 }
  0x35   : > { %p828_p10 = pnand %p827_p6, %p821_p3 }
  0x37   : > { %831 = shalt.err (!%p828_p10)
}
  0x38   : > { %702 = dma.hbm_to_vmem [thread:$0]  (!%p1142_p12), %s1136_s30, 128, %s1146_s5, %s1148_s11  }
  0x39   : > { %p1399_p2 = scmp.eq.s32.totalorder %s1082_s21, 0  ;;  %p644_p11 = scmp.ge.s32.totalorder %s1004_s20, 1 }
  0x3a   : > { %p167_p0 = scmp.lt.s32.totalorder %s1004_s20, 3  ;;  %p1411_p9 = scmp.ne.s32.totalorder %s988_s16, %s984_s15 }
  0x3b   : > { %s1007_s6 = smov [#allocation6]   ;;  %s92_s5 = sand.u32 1, %s1105_s29  }
  0x3c   : > { %p1184_p3 = por %p1399_p2, %p1411_p9  ;;  %s182_s27 = sshll.u32 %s1007_s6, 4  ;;  %s183_s27 = int_to_ptr.vmem [resolvable:$true] %s182_s27 }
  0x3d   : > { %p1188_p5 = pnand %p644_p11, %p167_p0  ;;  %s832_s23 = scalar_lea.hbm %s1391_s1, 256 }
  0x3e   : > { %s1412_s24 = scalar_select %p1184_p3, 1, 0 }
  0x3f   : > { %s1413_s22 = scalar_select %p1188_p5, 1, 0 }
  0x40   : > { %p695_p8 = pneg %p1188_p5  ;;  %p833_p13 = scmp.ne.s32.totalorder %s1391_s1, %s832_s23 }
  0x41   : > { %p839_p10 = scmp.lt.u32.totalorder %s832_s23, %s1391_s1 }
  0x42   : > { %p1196_p12 = pnand %p695_p8, %p1399_p2 }
  0x44   : > { %p834_p1 = pneg %p1196_p12 }
  0x46   : > { %p835_p4 = pnand %p834_p1, %p833_p13 }
  0x48   : > { %p836_p6 = pneg %p835_p4 }
  0x4a   : > { %p841_p11 = pnand %p839_p10, %p836_p6 }
  0x4c   : > { %844 = shalt.err (!%p841_p11)
}
  0x4d   : > { %s845_s19 = scalar_lea.vmem %s183_s27, 256  ;;  %p853_p2 = scmp.lt.s32.totalorder %s183_s27, %s183_s27 }
  0x4e   : > { %p846_p0 = scmp.ne.s32.totalorder %s183_s27, %s845_s19  ;;  %p854_p7 = scmp.lt.s32.totalorder %s845_s19, %s845_s19 }
  0x50   : > { %p848_p9 = pnand %p846_p0, %p834_p1  ;;  %p855_p3 = por %p854_p7, %p853_p2 }
  0x52   : > { %p849_p8 = pneg %p848_p9 }
  0x54   : > { %p856_p5 = pnand %p855_p3, %p849_p8 }
  0x56   : > { %859 = shalt.err (!%p856_p5)
}
  0x57   : > { %s1008_s29 = smov 128   ;;  %s1009_s0 = smov 8  }
  0x58   : > { %698 = dma.hbm_to_vmem [thread:$0]  (!%p1196_p12), %s1391_s1, 256, %s183_s27, [#allocation7], %s1008_s29, %s1008_s29, %s1009_s0  }
  0x59   : > { %s117_s10 = sadd.s32 1, %s980_s14  ;;  %p640_p7 = scmp.lt.s32.totalorder %s92_s5, 0 }
  0x5a   : > { %s99_s26 = sadd.s32 2, %s92_s5  ;;  %p643_p2 = scmp.lt.s32.totalorder %s1119_s8, 0 }
  0x5b   : > { %s112_s23 = sadd.s32 2, %s1119_s8  ;;  %s1436_s26 = smov (!%p640_p7, %s99_s26), %s92_s5 }
  0x5c   : > { %s1438_s23 = smov (!%p643_p2, %s112_s23), %s1119_s8  ;;  %p124_p3 = scmp.ne.s32.totalorder %s980_s14, %s976_s13 }
  0x5d   : > { %p130_p5 = scmp.ne.s32.totalorder %s976_s13, %s972_s12  ;;  %s114_s28 = ssub.s32 %s1436_s26, %s1438_s23 }
  0x5e   : > { %s216_s6 = sand.u32 1, %s980_s14   ;;  %p115_p13 = scmp.eq.s32.totalorder %s114_s28, 0 }
  0x5f   : > { %p1415_p1 = scmp.eq.s32.totalorder %s1004_s20, 0  ;;  %p1416_p6 = scmp.eq.s32.totalorder %s1082_s21, 0 }
  0x60   : > { %s649_s27 = sshll.u32 %s216_s6, 3  ;;  %s653_s0 = sshll.u32 %s1436_s26, 7 }
  0x61   : > { %p126_p4 = por %p124_p3, %p1415_p1  ;;  %p1230_p10 = por %p130_p5, %p1416_p6 }
  0x62   : > { %s1235_s29 = scalar_select %p115_p13, %s980_s14, %s117_s10  }
  0x63   : > { %s1240_s8 = scalar_lea.hbm %s1392_s2, %s653_s0  ;;  %s218_s12 = scalar_lea.vmem [#allocation8], %s649_s27 }
  0x64   : > { %s238_s19 = sshll.u32 %s218_s12, 4  ;;  %p1418_p12 = scmp.lt.s32.totalorder %s1004_s20, 2  ;;  %s1242_s19 = int_to_ptr.vmem [resolvable:$true] %s238_s19 }
  0x65   : > { %s860_s10 = scalar_lea.hbm %s1240_s8, 128  ;;  %s865_s6 = scalar_lea.hbm %s1392_s2, 256 }
  0x66   : > { %p1246_p11 = pnand %p1418_p12, %p126_p4  ;;  %p861_p0 = scmp.ne.s32.totalorder %s1240_s8, %s860_s10 }
  0x67   : > { %p866_p2 = scmp.lt.u32.totalorder %s1240_s8, %s1392_s2  ;;  %p867_p3 = scmp.lt.u32.totalorder %s865_s6, %s860_s10 }
  0x68   : > { %p862_p9 = pneg %p1246_p11  ;;  %p869_p13 = scmp.lt.u32.totalorder %s860_s10, %s1240_s8 }
  0x69   : > { %p868_p5 = por %p867_p3, %p866_p2 }
  0x6a   : > { %p863_p8 = pnand %p862_p9, %p861_p0 }
  0x6b   : > { %p870_p1 = por %p869_p13, %p868_p5 }
  0x6c   : > { %p864_p7 = pneg %p863_p8 }
  0x6e   : > { %p871_p4 = pnand %p870_p1, %p864_p7 }
  0x70   : > { %874 = shalt.err (!%p871_p4)
}
  0x71   : > { %s875_s25 = scalar_lea.vmem %s1242_s19, 128  ;;  %s1010_s5 = smov [#allocation8]  }
  0x72   : > { %p876_p6 = scmp.ne.s32.totalorder %s1242_s19, %s875_s25  ;;  %s880_s12 = sshll.u32 %s1010_s5, 4  ;;  %s881_s12 = int_to_ptr.vmem [resolvable:$false] %s880_s12 }
  0x73   : > { %s882_s26 = scalar_lea.vmem %s881_s12, 256  ;;  %p883_p8 = scmp.lt.s32.totalorder %s1242_s19, %s881_s12 }
  0x74   : > { %p878_p12 = pnand %p876_p6, %p862_p9  ;;  %p884_p2 = scmp.lt.s32.totalorder %s882_s26, %s875_s25 }
  0x76   : > { %p879_p0 = pneg %p878_p12  ;;  %p885_p3 = por %p884_p2, %p883_p8 }
  0x78   : > { %p886_p5 = pnand %p885_p3, %p879_p0 }
  0x7a   : > { %889 = shalt.err (!%p886_p5)
}
  0x7b   : > { %705 = dma.hbm_to_vmem [thread:$0]  (!%p1246_p11), %s1240_s8, 128, %s1242_s19, %s1148_s11  }
  0x7c   : > { %p1420_p7 = scmp.ne.s32.totalorder %s1413_s22, 0 }
  0x7d   : > { %s249_s10 = sand.u32 (!%p1420_p7), 1, %s1082_s21   ;;  %s251_s28 = sand.u32 (!%p1420_p7), 1, %s988_s16  }
  0x7e   : > { %247 = sbr.rel (%p1420_p7) target bundleno = 915 (0x393), region = 32  ;;  %s1282_s6 = sshll.u32 (!%p1420_p7), %s251_s28, 3 }
  0x7f   : > { %s250_s27 = scalar_lea.sflag (!%p1420_p7), [#allocation4], %s249_s10  ;;  %s253_s0 = scalar_lea.vmem (!%p1420_p7), [#allocation3], %s1282_s6 }
  0x80   : > { %p1421_p9 = scmp.ne.s32.totalorder (!%p1420_p7), %s1412_s24, 0 }
  0x85   : > { %955 = dma.done.wait (%p1421_p9), %s250_s27, 128  }
  0x86   : > { %957 = vsyncadd (%p1421_p9), %s250_s27, 4294967168  ;;  %p1422_p11 = scmp.eq.s32.totalorder %s1082_s21, 0 }
  0x88   : > { %959 = dma.done.wait (%p1422_p11), [#allocation7], 256   ;;  %p1423_p13 = pmov %p1422_p11 }
  0x89   : > { %s264_s11 = sand.u32 1, %s976_s13  }
  0x8a   : > { %961 = vsyncadd (%p1423_p13), [#allocation7], 4294967040  ;;  %s1294_s22 = sshll.u32 %s264_s11, 3 }
  0x8b   : > { %s266_s8 = scalar_lea.vmem [#allocation8], %s1294_s22 }
  0x8c   : > { %963 = dma.done.wait (%p1230_p10), %s250_s27, 128  }
  0x8d   : > { %965 = vsyncadd (%p1230_p10), %s250_s27, 4294967168  ;;  %vm312_vm0 = vcmask 7168   ;;  %v1011_v0 = vmov 0.0|0.0   ;;  %v1012_v1 = vmov 0.0   ;;  %vm1013_vm1 = vmmov 0   ;;  %v315_v2 = vld [vmem:[#allocation6] sm:$0xff] }
  0x8e   : > { %681 = vmatprep.subr.bf16.mxu0 %v1011_v0  ;;  %313 = vst.msk [vmem:[#allocation2] sm:$0xff] %vm312_vm0, %v1012_v1  ;;  %678 = vmatprep.mubr.msk.f32.mxu0 %vm1013_vm1, %v1012_v1  ;;  %vm318_vm2 = vcmask 261120   ;;  %v316_v3 = vld [vmem:[#allocation6 + $0x8] sm:$0xff]  ;;  %v1304_v4 = vld [vmem:[%s253_s0] sm:$0xff]  ;;  %v322_v5 = vmul.f32 %v315_v2, %v315_v2  ;;  %v441_v16 = vlaneseq  ;;  %vm455_vm4 = vcmask 130048   ;;  %s662_s21 = sshll.u32 %s996_s18, 3 }
  0x8f   : > { %vm683_vm3 = vmpackc.low %vm318_vm2, %vm318_vm2  ;;  %v323_v6 = vmul.f32 %v316_v3, %v316_v3  ;;  %v682_v7 = vpack.c.bf16 %v316_v3, %v315_v2  ;;  %v317_v8 = vmul.f32 %v1304_v4, %v1304_v4  ;;  %s670_s24 = sadd.s32 8, %s662_s21  ;;  %p465_p10 = scmp.lt.s32.totalorder %s662_s21, 16 }
  0x90   : > { %v324_v9 = vsel %vm318_vm2, %v322_v5, 0.0  ;;  %v442_v17 = vshrl.u32 %v441_v16, 7  ;;  %p664_p1 = scmp.gt.s32.totalorder %s670_s24, 0  ;;  %s293_s30 = scalar_lea.vmem [#allocation9], %s1282_s6 }
  0x91   : > { %684 = vmatpush3.bf16.xpose.msk.msra.mxu0 %vm683_vm3, %v682_v7  ;;  %v319_v10 = vsel %vm318_vm2, %v317_v8, 0.0  ;;  %325 = vadd.xlane.f32.xlu0 %v324_v9  ;;  %v327_v11 = vsel %vm318_vm2, %v323_v6, 0.0 }
  0x92   : > { %320 = vadd.xlane.f32.xlu1 %v319_v10  ;;  %v443_v19 = vsub.s32 0, %v442_v17  ;;  %p470_p4 = pnand %p664_p1, %p465_p10 }
  0x93   : > { %v476_v35 = vstv (!%p470_p4), %s662_s21  ;;  %v479_v36 = vand.u32 (!%p470_p4), 127, %v441_v16 }
  0x94   : > { %v477_v37 = vadd.s32 (!%p470_p4), %v476_v35, %v442_v17 }
  0x95   : > { %328 = vadd.xlane.f32.xlu0 %v327_v11  ;;  %v454_v32 = vld [vmem:[#allocation2] sm:$0xff] }
  0x96   : > { %vm482_vm5 = vcmp.eq.s32.totalorder (!%p470_p4), %v477_v37, %v479_v36 }
  0x98   : > { %679 = vmatmul.mubr.msk.f32.vlgmr.msra.gmra.mrb[0].mxu0 %vm318_vm2, %v1304_v4 }
 0x11e   : > { %v326_v12 = vpop.xlane.xlu0 %325 }
 0x11f   : > { %409 = vxpose.xlu1.b32.start [1/2] (short) (narrow) %v326_v12, 8  ;;  %v321_v18 = vpop.xlane.xlu1 %320 }
 0x122   : > { %v329_v13 = vpop.xlane.xlu0 %328 }
 0x123   : > { %410 = vxpose.xlu1.b32.end [2/2] (short) (narrow) %v329_v13, 8 }
 0x16b   : > { %v405_v14 = vpop.f32.mrb[0].mxu0 }
 0x16c   : > { %v680_v15 = vpop.f32.mrb[1].mxu0  ;;  %v446_v22 = vmul.f32 2.0, %v405_v14 }
 0x19f   : > { %v425_v20 = vpop.trf.xlu1 }
 0x1a0   : > { %v444_v21 = vrot.slane %v425_v20, %v443_v19 }
 0x1a2   : > { %v445_v23 = vadd.f32 %v444_v21, %v321_v18 }
 0x1a4   : > { %v447_v24 = vsub.f32 %v445_v23, %v446_v22 }
 0x1a6   : > { %v448_v25 = vmax.f32 %v447_v24, 0.0 }
 0x1a8   : > { %v449_v26 = vmul.f32 -0.5, %v448_v25 }
 0x1aa   : > { %v450_v27 = vmul.f32 1.442695, %v449_v26 }
 0x1ac   : > { %793 = vpow2.f32 %v450_v27 }
 0x1b6   : > { %v794_v28 = vpop.eup %793 }
 0x1b7   : > { %v452_v29 = vmul.f32 1.442695, %v794_v28 }
 0x1b9   : > { %795 = vpow2.f32 %v452_v29 }
 0x1c3   : > { %v796_v30 = vpop.eup %795 }
 0x1c4   : > { %v456_v31 = vsel %vm455_vm4, %v796_v30, 0.0  ;;  %v483_v38 = vsel (!%p470_p4), %vm482_vm5, %v796_v30, 0.0 }
 0x1c5   : > { %457 = vadd.xlane.f32.xlu0 %v456_v31  ;;  %v485_v39 = vsel (!%p470_p4), %vm455_vm4, %v483_v38, 0.0 }
 0x1c9   : > { %486 = vadd.xlane.f32.xlu0 (!%p470_p4), %v485_v39 }
 0x24f   : > { %473 = sbr.rel (%p470_p4) target bundleno = 608 (0x260), region = 52 }
 0x252   : > { %v458_v33 = vpop.xlane.xlu0 %457 }
 0x253   : > { %v459_v34 = vadd.f32 %v458_v33, %v454_v32 }
 0x255   : > { %461 = vst.msk [vmem:[#allocation2] sm:$0xff] %vm312_vm0, %v459_v34 }
 0x256   : > { %v487_v41 = vpop.xlane.xlu0 %486 }
 0x25c   : > { %v484_v40 = vld [vmem:[#allocation2] sm:$0xff] }
 0x25d   : > { %v488_v42 = vsub.f32 %v484_v40, %v487_v41 }
 0x25f   : > { %489 = vst.msk [vmem:[#allocation2] sm:$0xff] %vm312_vm0, %v488_v42 }
 0x260 PF: > { %v493_v43 = vld [vmem:[%s266_s8] sm:$0xff]  ;;  %v1014_v47 = vmov 0   ;;  %s666_s19 = sshll.u32 %s996_s18, 7  ;;  %s526_s23 = sshll.u32 %s293_s30, 4  ;;  %s1331_s23 = int_to_ptr.vmem [resolvable:$true] %s526_s23 }
 0x261   : > { %v494_v44 = vsub.f32 %v1304_v4, %v493_v43  ;;  %797 = vset.pattern.permute.xlu0 %v1014_v47  ;;  %s1329_s12 = scalar_lea.hbm %s1393_s3, %s666_s19  ;;  %s513_s26 = scalar_lea.sflag [#allocation5], %s251_s28 }
 0x262   : > { %s890_s10 = scalar_lea.vmem %s1331_s23, 128  ;;  %p1424_p12 = scmp.ne.s32.totalorder %s1407_s7, 0 }
 0x263   : > { %v495_v45 = vmul.f32 %v494_v44, %v494_v44  ;;  %p891_p6 = scmp.ne.s32.totalorder %s1331_s23, %s890_s10  ;;  %s1015_s18 = smov [#allocation9]  }
 0x264   : > { %s894_s27 = sshll.u32 %s1015_s18, 4  ;;  %s895_s27 = int_to_ptr.vmem [resolvable:$false] %s894_s27 }
 0x265   : > { %v496_v46 = vsel %vm318_vm2, %v495_v45, 0.0  ;;  %p892_p0 = pnand %p891_p6, %p1424_p12  ;;  %s896_s0 = scalar_lea.vmem %s895_s27, 256 }
 0x266   : > { %497 = vadd.xlane.f32.xlu0 %v496_v46  ;;  %v502_v48 = vld [vmem:[#allocation2] sm:$0xff]  ;;  %p897_p2 = scmp.lt.s32.totalorder %s1331_s23, %s895_s27  ;;  %p898_p3 = scmp.lt.s32.totalorder %s896_s0, %s890_s10 }
 0x267   : > { %798 = vlog2.f32 %v502_v48  ;;  %p893_p8 = pneg %p892_p0 }
 0x268   : > { %p899_p5 = por %p898_p3, %p897_p2 }
 0x26a   : > { %p900_p7 = pnand %p899_p5, %p893_p8 }
 0x271   : > { %v799_v52 = vpop.eup %798 }
 0x272   : > { %v504_v53 = vmul.f32 0.6931472, %v799_v52 }
 0x2f3   : > { %v498_v49 = vpop.xlane.xlu0 %497 }
 0x2f4   : > { %v499_v50 = vmul.f32 -0.5, %v498_v49 }
 0x2f6   : > { %v500_v51 = vmul.f32 1.442695, %v499_v50 }
 0x2f8   : > { %800 = vpow2.f32 %v500_v51 }
 0x302   : > { %v801_v54 = vpop.eup %800 }
 0x303   : > { %v505_v55 = vsub.f32 %v504_v53, %v801_v54 }
 0x305   : > { %508 = vperm.xlu0 %797, %v505_v55  }
 0x384   : > { %v509_v56 = vpop.permute.xlu0 %508 }
 0x385   : > { %511 = vst [vmem:[%s293_s30] sm:$0xff] %v509_v56 }
 0x386   : > { %903 = shalt.err (!%p900_p7)
}
 0x387   : > { %s904_s28 = scalar_lea.hbm %s1329_s12, 128  ;;  %s908_s22 = scalar_lea.hbm %s1393_s3, 256 }
 0x388   : > { %p905_p9 = scmp.ne.s32.totalorder %s1329_s12, %s904_s28  ;;  %p909_p10 = scmp.lt.u32.totalorder %s1329_s12, %s1393_s3 }
 0x389   : > { %p910_p1 = scmp.lt.u32.totalorder %s908_s22, %s904_s28  ;;  %p912_p6 = scmp.lt.u32.totalorder %s904_s28, %s1329_s12 }
 0x38a   : > { %p906_p11 = pnand %p905_p9, %p1424_p12 }
 0x38b   : > { %p911_p4 = por %p910_p1, %p909_p10 }
 0x38c   : > { %p907_p13 = pneg %p906_p11 }
 0x38d   : > { %p913_p0 = por %p912_p6, %p911_p4 }
 0x38f   : > { %p914_p8 = pnand %p913_p0, %p907_p13 }
 0x391   : > { %917 = shalt.err (!%p914_p8)
}
 0x392   : > { %693 = dma.vmem_to_hbm [thread:$0]  (%p1424_p12), %s1331_s23, 128, %s1329_s12, %s513_s26  }
 0x393 PF: > { %s538_s24 = sand.u32 1, %s984_s15   ;;  %p1425_p2 = scmp.ne.s32.totalorder %s1408_s9, 0 }
 0x394   : > { %p1426_p3 = scmp.ge.s32.totalorder %s1004_s20, 2  ;;  %s539_s30 = scalar_lea.sflag [#allocation5], %s538_s24 }
 0x396   : > { %p707_p5 = pnand %p1426_p3, %p1425_p2 }
 0x398   : > { %967 = dma.done.wait (!%p707_p5), %s539_s30, 128  }
 0x399   : > { %969 = vsyncadd (!%p707_p5), %s539_s30, 4294967168  ;;  %s20_s20 = sadd.s32 1, %s1004_s20   ;;  %s1427_s18 = sld [smem:[#allocation14_spill]] }
 0x39a   : > { %p17_p7 = scmp.ge.s32.totalorder %s20_s20, 4   ;;  %s1428_s19 = sld [smem:[#allocation15_spill]] }
 0x39b   : > { %s1429_s12 = smov %s976_s13  ;;  %s1430_s13 = smov %s980_s14 }
 0x39c   : > { %s1431_s14 = smov %s1235_s29  ;;  %s1432_s15 = smov %s988_s16 }
 0x39d   : > { %s1433_s16 = smov %s992_s17  ;;  %s1434_s17 = smov %s1110_s4 }
 0x39e   :  { %19 = sbr.rel (!%p17_p7) target bundleno = 11 (0xb), region = 105 }
 0x3a5   :  { %544 = vsyncpa [#allocation4], 1 }
 0x3a6   :  { %546 = vsyncpa [#allocation4 + $0x1], 1 }
 0x3a7   :  { %547 = vsyncpa [#allocation7], 1 }
 0x3a8   :  { %548 = vsyncpa [#allocation5], 1 }
 0x3a9   :  { %550 = vsyncpa [#allocation5 + $0x1], 1 }

</bundles_post_ra>
